<compile_context>
chip_gen: v7x
topology: tpu7x:2x2x1
jax: 0.10.0
libtpu: 0.0.40
codegen_flags: <defaults>
</compile_context>

<pallas_src>
import jax
import jax.numpy as jnp
import numpy as np
from jax.experimental import pallas as pl
from jax.experimental.pallas import tpu as pltpu

BN_EPS = 1e-5
LANE = 128
SUBLANE = 8
VMEM_LIMIT_BYTES = 32 * 1024 * 1024  # tiles (<~2.5 MiB double-buffered) << limit; fits v7x's 64 MiB


def _round_up(x, n):
    return ((x + n - 1) // n) * n


def _make_conv_stats_kernel(m_true, tm, needs_mask):
    """Phase 1: conv matmul per tile + cross-tile per-channel sum / sumsq accumulation."""
    inv_m = np.float32(1.0 / m_true)

    def kernel(p_ref, w_ref, gb_ref, y_ref, ss_ref, sum_ref, sq_ref):
        mi = pl.program_id(1)

        @pl.when(mi == 0)
        def _():
            sum_ref[...] = jnp.zeros_like(sum_ref)
            sq_ref[...] = jnp.zeros_like(sq_ref)

        # Conv tile on the MXU: bf16 x bf16 -> f32 accumulation.
        y = jnp.dot(p_ref[...], w_ref[...], preferred_element_type=jnp.float32)
        y_ref[...] = y.astype(y_ref.dtype)  # bf16 raw conv intermediate for phase 2

        if needs_mask:  # only the last tile can hold zero-padded (invalid) rows
            row = jax.lax.broadcasted_iota(jnp.int32, (tm, 1), 0) + mi * tm
            yv = y * (row < m_true).astype(jnp.float32)
        else:
            yv = y
        sum_ref[...] += jnp.sum(yv, axis=0, keepdims=True)
        sq_ref[...] += jnp.sum(yv * yv, axis=0, keepdims=True)

        @pl.when(mi == pl.num_programs(1) - 1)
        def _():
            mean = sum_ref[...] * inv_m
            var = sq_ref[...] * inv_m - mean * mean           # biased variance (train-mode BN)
            scale = gb_ref[0:1, :] * jax.lax.rsqrt(var + BN_EPS)
            shift = gb_ref[1:2, :] - mean * scale
            ss_ref[0:1, :] = scale
            ss_ref[1:2, :] = shift

    return kernel


def _bn_relu6_kernel(y_ref, ss_ref, o_ref):
    """Phase 2: y*scale + shift, then ReLU6. f32 VPU math, lane-dense output stores."""
    y_hat = y_ref[...].astype(jnp.float32) * ss_ref[0:1, :] + ss_ref[1:2, :]
    o_ref[...] = jnp.clip(y_hat, 0.0, 6.0).astype(o_ref.dtype)


def _im2col(x, kh, kw, stride, ho, wo):
    """x: [N, Hp, Wp, C] (already zero-padded) -> [N, Ho, Wo, kh*kw*C] (tap-major, channel-minor)."""
    cols = []
    for i in range(kh):
        for j in range(kw):
            cols.append(x[:, i:i + stride * (ho - 1) + 1:stride,
                           j:j + stride * (wo - 1) + 1:stride, :])
    return jnp.concatenate(cols, axis=-1)


def conv2d_norm_activation(x_nchw, weight, gamma, beta, *,
                           stride=1, padding=0, groups=1, tm=512):
    """Conv2d(bias=False) -> BatchNorm2d (train-mode batch stats) -> ReLU6. NCHW in/out."""
    n, cin, h, w = x_nchw.shape
    cout, cin_g, kh, kw = weight.shape
    assert cin % groups == 0 and cout % groups == 0 and cin_g == cin // groups
    ho = (h + 2 * padding - kh) // stride + 1
    wo = (w + 2 * padding - kw) // stride + 1
    m = n * ho * wo
    cout_g = cout // groups
    k = kh * kw * cin_g

    k_pad = _round_up(k, LANE)          # unmasked loads / full MXU contraction feed
    c_pad = _round_up(cout_g, LANE)     # lane-dense (unmasked) output stores
    tm_eff = min(_round_up(m, SUBLANE), _round_up(tm, SUBLANE))
    m_pad = _round_up(m, tm_eff)
    mt = m_pad // tm_eff

    # Host-side layout: padded NHWC -> per-group im2col patches (group-vectorized; group
    # channels are contiguous in the PyTorch layout); K/C zero-padded, bf16 for the MXU.
    x_nhwc = jnp.transpose(x_nchw, (0, 2, 3, 1)).astype(jnp.float32)
    x_p = jnp.pad(x_nhwc, ((0, 0), (padding, padding), (padding, padding), (0, 0)))
    full = _im2col(x_p, kh, kw, stride, ho, wo)                  # [N,Ho,Wo, kh*kw*Cin]
    full = full.reshape(m, kh * kw, groups, cin_g)
    patches = jnp.transpose(full, (2, 0, 1, 3)).reshape(groups, m, k)   # [G, M, K]
    patches = jnp.pad(patches, ((0, 0), (0, m_pad - m), (0, k_pad - k)))
    patches = patches.astype(jnp.bfloat16)

    # PyTorch weight [Cout, Cin_g, KH, KW] -> [G, K_pad, Cout_g_pad], matching im2col tap order.
    w_g = weight.reshape(groups, cout_g, cin_g, kh, kw).astype(jnp.float32)
    w_mat = jnp.transpose(w_g, (0, 3, 4, 2, 1)).reshape(groups, k, cout_g)
    w_mat = jnp.pad(w_mat, ((0, 0), (0, k_pad - k), (0, c_pad - cout_g)))
    w_mat = w_mat.astype(jnp.bfloat16)

    # gamma/beta packed as [G, 2, C_pad] f32 (padded channels get gamma=beta=0 -> output 0).
    gb = jnp.stack([gamma.reshape(groups, cout_g),
                    beta.reshape(groups, cout_g)], axis=1).astype(jnp.float32)
    gb = jnp.pad(gb, ((0, 0), (0, 0), (0, c_pad - cout_g)))

    # ---- Phase 1: conv tiles + BN statistics -> bf16 conv intermediate + (scale, shift) ----
    y_raw, ss = pl.pallas_call(
        _make_conv_stats_kernel(m, tm_eff, m_pad != m),
        out_shape=(jax.ShapeDtypeStruct((groups, m_pad, c_pad), jnp.bfloat16),
                   jax.ShapeDtypeStruct((groups, 2, c_pad), jnp.float32)),
        grid_spec=pltpu.PrefetchScalarGridSpec(
            num_scalar_prefetch=0,
            grid=(groups, mt),
            in_specs=[
                pl.BlockSpec((None, tm_eff, k_pad), lambda g, i: (g, i, 0)),   # patch tile
                pl.BlockSpec((None, k_pad, c_pad), lambda g, i: (g, 0, 0)),    # weights: resident over M
                pl.BlockSpec((None, 2, c_pad), lambda g, i: (g, 0, 0)),        # gamma/beta: resident
            ],
            out_specs=[
                pl.BlockSpec((None, tm_eff, c_pad), lambda g, i: (g, i, 0)),   # raw conv tile (bf16)
                pl.BlockSpec((None, 2, c_pad), lambda g, i: (g, 0, 0)),        # scale/shift (written last)
            ],
            scratch_shapes=[pltpu.VMEM((1, c_pad), jnp.float32),   # per-channel sum
                            pltpu.VMEM((1, c_pad), jnp.float32)],  # per-channel sum of squares
        ),
        compiler_params=pltpu.CompilerParams(
            dimension_semantics=("parallel", "arbitrary"),   # M axis carries the stats reduction
            vmem_limit_bytes=VMEM_LIMIT_BYTES),
    )(patches, w_mat, gb)

    # ---- Phase 2: stream tiles back, apply y*scale + shift and ReLU6 ----
    out = pl.pallas_call(
        _bn_relu6_kernel,
        out_shape=jax.ShapeDtypeStruct((groups, m_pad, c_pad), jnp.float32),
        grid_spec=pltpu.PrefetchScalarGridSpec(
            num_scalar_prefetch=0,
            grid=(groups, mt),
            in_specs=[
                pl.BlockSpec((None, tm_eff, c_pad), lambda g, i: (g, i, 0)),
                pl.BlockSpec((None, 2, c_pad), lambda g, i: (g, 0, 0)),        # scale/shift: resident
            ],
            out_specs=pl.BlockSpec((None, tm_eff, c_pad), lambda g, i: (g, i, 0)),
        ),
        compiler_params=pltpu.CompilerParams(
            dimension_semantics=("parallel", "parallel"),
            vmem_limit_bytes=VMEM_LIMIT_BYTES),
    )(y_raw, ss)

    # Drop padded rows/channels and return NCHW (channels are group-major, as in PyTorch).
    out = out[:, :m, :cout_g].reshape(groups, n, ho, wo, cout_g)
    out = jnp.transpose(out, (1, 0, 4, 2, 3)).reshape(n, cout, ho, wo)
    return out


def _reference(x, weight, gamma, beta, *, stride, padding, groups):
    y = jax.lax.conv_general_dilated(
        x, weight, window_strides=(stride, stride),
        padding=[(padding, padding), (padding, padding)],
        dimension_numbers=("NCHW", "OIHW", "NCHW"),
        feature_group_count=groups)
    mean = jnp.mean(y, axis=(0, 2, 3), keepdims=True)
    var = jnp.mean(jnp.square(y - mean), axis=(0, 2, 3), keepdims=True)
    y = (y - mean) * jax.lax.rsqrt(var + BN_EPS) * gamma.reshape(1, -1, 1, 1) \
        + beta.reshape(1, -1, 1, 1)
    return jnp.clip(y, 0.0, 6.0)


if __name__ == "__main__":
    key = jax.random.PRNGKey(0)
    k1, k2, k3, k4 = jax.random.split(key, 4)

    # Small shapes consistent with the module: Conv2d(4, 8, k=3, stride=1, pad=1)
    N, Cin, H, W = 2, 4, 16, 16
    Cout, KH, KW = 8, 3, 3
    stride, padding, groups = 1, 1, 1

    x = jax.random.normal(k1, (N, Cin, H, W), jnp.float32)
    fan_in = (Cin // groups) * KH * KW
    weight = jax.random.normal(k2, (Cout, Cin // groups, KH, KW), jnp.float32) / np.sqrt(fan_in)
    gamma = 1.0 + 0.1 * jax.random.normal(k3, (Cout,), jnp.float32)   # BN weight
    beta = 0.1 * jax.random.normal(k4, (Cout,), jnp.float32)          # BN bias

    out = conv2d_norm_activation(x, weight, gamma, beta,
                                 stride=stride, padding=padding, groups=groups)
    out = jax.block_until_ready(out)

    ref = _reference(x, weight, gamma, beta, stride=stride, padding=padding, groups=groups)
    # The MXU is fed bf16 activations/weights with f32 accumulation and the conv
    # intermediate is round-tripped through HBM in bf16; BN stats and all elementwise
    # math stay f32.  Compare against the f32 reference with a bf16-appropriate tolerance.
    np.testing.assert_allclose(np.asarray(out), np.asarray(ref), rtol=2.5e-2, atol=2.5e-2)

    print("KERNEL_OK")
</pallas_src>

<mosaic_0001>
module attributes {stable_mosaic.version = 11 : i64} {
  func.func @kernel(%arg0: i32, %arg1: i32, %arg2: memref<1x512x128xbf16, #tpu.memory_space<vmem>>, %arg3: memref<1x128x128xbf16, #tpu.memory_space<vmem>>, %arg4: memref<1x2x128xf32, #tpu.memory_space<vmem>>, %arg5: memref<1x512x128xbf16, #tpu.memory_space<vmem>>, %arg6: memref<1x2x128xf32, #tpu.memory_space<vmem>>, %arg7: memref<1x128xf32, #tpu.memory_space<vmem>>, %arg8: memref<1x128xf32, #tpu.memory_space<vmem>>) attributes {dimension_semantics = [#tpu.dimension_semantics<parallel>, #tpu.dimension_semantics<arbitrary>], iteration_bounds = array<i64: 1, 1>, scalar_prefetch = 0 : i64, scratch_operands = 2 : i64, tpu.core_type = #tpu.core_type<tc>, window_params = [{transform_indices = @transform_0, window_bounds = array<i64: 1, 512, 128>}, {transform_indices = @transform_1, window_bounds = array<i64: 1, 128, 128>}, {transform_indices = @transform_2, window_bounds = array<i64: 1, 2, 128>}, {transform_indices = @transform_3, window_bounds = array<i64: 1, 512, 128>}, {transform_indices = @transform_4, window_bounds = array<i64: 1, 2, 128>}]} {
    %c0_i32 = arith.constant 0 : i32
    %0 = arith.cmpi eq, %arg1, %c0_i32 : i32
    %1 = arith.extui %0 : i1 to i32
    %c0_i32_0 = arith.constant 0 : i32
    %2 = arith.cmpi ne, %1, %c0_i32_0 : i32
    scf.if %2 {
      %cst_21 = arith.constant 0.000000e+00 : f32
      %26 = vector.broadcast %cst_21 : f32 to vector<1x128xf32>
      %c0_22 = arith.constant 0 : index
      %c0_23 = arith.constant 0 : index
      %27 = vector.load %arg7[%c0_22, %c0_23] : memref<1x128xf32, #tpu.memory_space<vmem>>, vector<1x128xf32>
      tpu.vector_store %arg7[%c0_22, %c0_23], %26 {strides = array<i32>} : memref<1x128xf32, #tpu.memory_space<vmem>>, vector<1x128xf32>,
      %cst_24 = arith.constant 0.000000e+00 : f32
      %28 = vector.broadcast %cst_24 : f32 to vector<1x128xf32>
      %c0_25 = arith.constant 0 : index
      %c0_26 = arith.constant 0 : index
      %29 = vector.load %arg8[%c0_25, %c0_26] : memref<1x128xf32, #tpu.memory_space<vmem>>, vector<1x128xf32>
      tpu.vector_store %arg8[%c0_25, %c0_26], %28 {strides = array<i32>} : memref<1x128xf32, #tpu.memory_space<vmem>>, vector<1x128xf32>,
    } else {
    }
    %c0 = arith.constant 0 : index
    %c0_1 = arith.constant 0 : index
    %c0_2 = arith.constant 0 : index
    %3 = vector.load %arg2[%c0, %c0_1, %c0_2] : memref<1x512x128xbf16, #tpu.memory_space<vmem>>, vector<1x512x128xbf16>
    %4 = vector.shape_cast %3 : vector<1x512x128xbf16> to vector<512x128xbf16>
    %c0_3 = arith.constant 0 : index
    %c0_4 = arith.constant 0 : index
    %c0_5 = arith.constant 0 : index
    %5 = vector.load %arg3[%c0_3, %c0_4, %c0_5] : memref<1x128x128xbf16, #tpu.memory_space<vmem>>, vector<1x128x128xbf16>
    %6 = vector.shape_cast %5 : vector<1x128x128xbf16> to vector<128x128xbf16>
    %cst = arith.constant dense<0.000000e+00> : vector<512x128xf32>
    %7 = tpu.matmul %4, %6, %cst {dimension_numbers = #tpu.dot_dimension_numbers<[1], [0], [0], [1], [0, 0, 1, 1], [], []>} : vector<512x128xbf16>, vector<128x128xbf16>, vector<512x128xf32> -> vector<512x128xf32>
    %8 = arith.truncf %7 : vector<512x128xf32> to vector<512x128xbf16>
    %c0_6 = arith.constant 0 : index
    %c0_7 = arith.constant 0 : index
    %c0_8 = arith.constant 0 : index
    %9 = vector.load %arg5[%c0_6, %c0_7, %c0_8] : memref<1x512x128xbf16, #tpu.memory_space<vmem>>, vector<1x512x128xbf16>
    %10 = vector.shape_cast %9 : vector<1x512x128xbf16> to vector<512x128xbf16>
    %11 = vector.shape_cast %8 : vector<512x128xbf16> to vector<1x512x128xbf16>
    tpu.vector_store %arg5[%c0_6, %c0_7, %c0_8], %11 {strides = array<i32>} : memref<1x512x128xbf16, #tpu.memory_space<vmem>>, vector<1x512x128xbf16>,
    %c0_9 = arith.constant 0 : index
    %c0_10 = arith.constant 0 : index
    %12 = vector.load %arg7[%c0_9, %c0_10] : memref<1x128xf32, #tpu.memory_space<vmem>>, vector<1x128xf32>
    %cst_11 = arith.constant dense<0.000000e+00> : vector<128xf32>
    %13 = vector.multi_reduction <add>, %7, %cst_11 [0] : vector<512x128xf32> to vector<128xf32>
    %14 = vector.shape_cast %13 : vector<128xf32> to vector<1x128xf32>
    %15 = arith.addf %12, %14 : vector<1x128xf32>
    %c0_12 = arith.constant 0 : index
    %c0_13 = arith.constant 0 : index
    %16 = vector.load %arg7[%c0_12, %c0_13] : memref<1x128xf32, #tpu.memory_space<vmem>>, vector<1x128xf32>
    tpu.vector_store %arg7[%c0_12, %c0_13], %15 {strides = array<i32>} : memref<1x128xf32, #tpu.memory_space<vmem>>, vector<1x128xf32>,
    %c0_14 = arith.constant 0 : index
    %c0_15 = arith.constant 0 : index
    %17 = vector.load %arg8[%c0_14, %c0_15] : memref<1x128xf32, #tpu.memory_space<vmem>>, vector<1x128xf32>
    %18 = arith.mulf %7, %7 : vector<512x128xf32>
    %cst_16 = arith.constant dense<0.000000e+00> : vector<128xf32>
    %19 = vector.multi_reduction <add>, %18, %cst_16 [0] : vector<512x128xf32> to vector<128xf32>
    %20 = vector.shape_cast %19 : vector<128xf32> to vector<1x128xf32>
    %21 = arith.addf %17, %20 : vector<1x128xf32>
    %c0_17 = arith.constant 0 : index
    %c0_18 = arith.constant 0 : index
    %22 = vector.load %arg8[%c0_17, %c0_18] : memref<1x128xf32, #tpu.memory_space<vmem>>, vector<1x128xf32>
    tpu.vector_store %arg8[%c0_17, %c0_18], %21 {strides = array<i32>} : memref<1x128xf32, #tpu.memory_space<vmem>>, vector<1x128xf32>,
    %c0_i32_19 = arith.constant 0 : i32
    %23 = arith.cmpi eq, %arg1, %c0_i32_19 : i32
    %24 = arith.extui %23 : i1 to i32
    %c0_i32_20 = arith.constant 0 : i32
    %25 = arith.cmpi ne, %24, %c0_i32_20 : i32
    scf.if %25 {
      %c0_21 = arith.constant 0 : index
      %c0_22 = arith.constant 0 : index
      %26 = vector.load %arg7[%c0_21, %c0_22] : memref<1x128xf32, #tpu.memory_space<vmem>>, vector<1x128xf32>
      %cst_23 = arith.constant 0.001953125 : f32
      %27 = vector.broadcast %cst_23 : f32 to vector<1x128xf32>
      %28 = arith.mulf %26, %27 : vector<1x128xf32>
      %c0_24 = arith.constant 0 : index
      %c0_25 = arith.constant 0 : index
      %29 = vector.load %arg8[%c0_24, %c0_25] : memref<1x128xf32, #tpu.memory_space<vmem>>, vector<1x128xf32>
      %cst_26 = arith.constant 0.001953125 : f32
      %30 = vector.broadcast %cst_26 : f32 to vector<1x128xf32>
      %31 = arith.mulf %29, %30 : vector<1x128xf32>
      %32 = arith.mulf %28, %28 : vector<1x128xf32>
      %33 = arith.subf %31, %32 : vector<1x128xf32>
      %c0_27 = arith.constant 0 : index
      %c0_28 = arith.constant 0 : index
      %c0_29 = arith.constant 0 : index
      %34 = vector.load %arg4[%c0_27, %c0_28, %c0_29] : memref<1x2x128xf32, #tpu.memory_space<vmem>>, vector<1x1x128xf32>
      %35 = vector.shape_cast %34 : vector<1x1x128xf32> to vector<1x128xf32>
      %cst_30 = arith.constant 9.99999974E-6 : f32
      %36 = vector.broadcast %cst_30 : f32 to vector<1x128xf32>
      %37 = arith.addf %33, %36 : vector<1x128xf32>
      %38 = math.rsqrt %37 : vector<1x128xf32>
      %39 = arith.mulf %35, %38 : vector<1x128xf32>
      %c0_31 = arith.constant 0 : index
      %c1 = arith.constant 1 : index
      %c0_32 = arith.constant 0 : index
      %40 = vector.load %arg4[%c0_31, %c1, %c0_32] : memref<1x2x128xf32, #tpu.memory_space<vmem>>, vector<1x1x128xf32>
      %41 = vector.shape_cast %40 : vector<1x1x128xf32> to vector<1x128xf32>
      %42 = arith.mulf %28, %39 : vector<1x128xf32>
      %43 = arith.subf %41, %42 : vector<1x128xf32>
      %c0_33 = arith.constant 0 : index
      %c0_34 = arith.constant 0 : index
      %c0_35 = arith.constant 0 : index
      %44 = vector.load %arg6[%c0_33, %c0_34, %c0_35] : memref<1x2x128xf32, #tpu.memory_space<vmem>>, vector<1x1x128xf32>
      %45 = vector.shape_cast %44 : vector<1x1x128xf32> to vector<1x128xf32>
      %46 = vector.shape_cast %39 : vector<1x128xf32> to vector<1x1x128xf32>
      tpu.vector_store %arg6[%c0_33, %c0_34, %c0_35], %46 {strides = array<i32>} : memref<1x2x128xf32, #tpu.memory_space<vmem>>, vector<1x1x128xf32>,
      %c0_36 = arith.constant 0 : index
      %c1_37 = arith.constant 1 : index
      %c0_38 = arith.constant 0 : index
      %47 = vector.load %arg6[%c0_36, %c1_37, %c0_38] : memref<1x2x128xf32, #tpu.memory_space<vmem>>, vector<1x1x128xf32>
      %48 = vector.shape_cast %47 : vector<1x1x128xf32> to vector<1x128xf32>
      %49 = vector.shape_cast %43 : vector<1x128xf32> to vector<1x1x128xf32>
      tpu.vector_store %arg6[%c0_36, %c1_37, %c0_38], %49 {strides = array<i32>} : memref<1x2x128xf32, #tpu.memory_space<vmem>>, vector<1x1x128xf32>,
    } else {
    }
    return
  }
  func.func @transform_0(%arg0: i32, %arg1: i32) -> (i32, i32, i32) {
    %c0_i32 = arith.constant 0 : i32
    %c0_i32_0 = arith.constant 0 : i32
    return %arg0, %arg1, %c0_i32 : i32, i32, i32
  }
  func.func @transform_1(%arg0: i32, %arg1: i32) -> (i32, i32, i32) {
    %c0_i32 = arith.constant 0 : i32
    %c0_i32_0 = arith.constant 0 : i32
    %c0_i32_1 = arith.constant 0 : i32
    return %arg0, %c0_i32, %c0_i32_0 : i32, i32, i32
  }
  func.func @transform_2(%arg0: i32, %arg1: i32) -> (i32, i32, i32) {
    %c0_i32 = arith.constant 0 : i32
    %c0_i32_0 = arith.constant 0 : i32
    %c0_i32_1 = arith.constant 0 : i32
    return %arg0, %c0_i32, %c0_i32_0 : i32, i32, i32
  }
  func.func @transform_3(%arg0: i32, %arg1: i32) -> (i32, i32, i32) {
    %c0_i32 = arith.constant 0 : i32
    %c0_i32_0 = arith.constant 0 : i32
    return %arg0, %arg1, %c0_i32 : i32, i32, i32
  }
  func.func @transform_4(%arg0: i32, %arg1: i32) -> (i32, i32, i32) {
    %c0_i32 = arith.constant 0 : i32
    %c0_i32_0 = arith.constant 0 : i32
    %c0_i32_1 = arith.constant 0 : i32
    return %arg0, %c0_i32, %c0_i32_0 : i32, i32, i32
  }
}

</mosaic_0001>

<bundles_post_ra>
// kernel: tpu_custom_call.1
= control target key start
LH: loop header
LB: loop body
LE: loop exit
PB: predicated region body
PF: predicated region fallthrough
CT: control target
= control target key end

     0   :  { %10 = vsyncpa [#allocation5], 0  ;;  %s2167_s0 = inlined_call_operand.hbm [shape: bf16[1,512,128], index: 0, kind: input, shape index: {}]   ;;  %s2168_s1 = inlined_call_operand.hbm [shape: bf16[1,128,128], index: 1, kind: input, shape index: {}]   ;;  %s2169_s2 = inlined_call_operand.vmem [shape: f32[1,2,128], index: 2, kind: input, shape index: {}]   ;;  %s2170_s3 = inlined_call_operand.hbm [shape: bf16[1,512,128], index: 3, kind: output, shape index: {0}]   ;;  %s2171_s4 = inlined_call_operand.hbm [shape: f32[1,2,128], index: 4, kind: output, shape index: {1}]  }
   0x1   :  { %11 = vsyncpa [#allocation8], 0 }
   0x2   :  { %12 = vsyncpa [#allocation6], 0 }
   0x3   :  { %13 = vsyncpa [#allocation11], 0  ;;  %s1880_s15 = smov [#allocation4]   ;;  %s1784_s19 = scalar_lea.hbm %s2167_s0, 4096 }
   0x4   :  { %s19_s16 = sshll.u32 %s1880_s15, 4  ;;  %p1785_p0 = scmp.ne.s32.totalorder %s2167_s0, %s1784_s19  ;;  %s20_s16 = int_to_ptr.vmem [resolvable:$true] %s19_s16 }
   0x5   :  { %p1788_p1 = scmp.lt.u32.totalorder %s1784_s19, %s2167_s0 }
   0x7   :  { %p1790_p2 = pnand %p1788_p1, %p1785_p0 }
   0x9   :  { %1793 = shalt.err (!%p1790_p2)
}
   0xa   :  { %s1794_s24 = scalar_lea.vmem %s20_s16, 4096  ;;  %p1799_p4 = scmp.lt.s32.totalorder %s20_s16, %s20_s16 }
   0xb   :  { %p1795_p3 = scmp.ne.s32.totalorder %s20_s16, %s1794_s24  ;;  %p1800_p5 = scmp.lt.s32.totalorder %s1794_s24, %s1794_s24 }
   0xd   :  { %p1801_p6 = por %p1800_p5, %p1799_p4 }
   0xf   :  { %p1802_p7 = pnand %p1801_p6, %p1795_p3 }
  0x11   :  { %1805 = shalt.err (!%p1802_p7)
}
  0x12   :  { %s1881_s25 = smov 64   ;;  %s1882_s26 = smov 4  }
  0x13   :  { %25 = dma.hbm_to_vmem [thread:$0]  %s2167_s0, 4096, %s20_s16, [#allocation5], %s1881_s25, %s1881_s25, %s1882_s26  }
  0x14   :  { %s1883_s29 = smov [#allocation7]   ;;  %s1806_s7 = scalar_lea.hbm %s2168_s1, 1024 }
  0x15   :  { %s31_s30 = sshll.u32 %s1883_s29, 4  ;;  %p1807_p8 = scmp.ne.s32.totalorder %s2168_s1, %s1806_s7  ;;  %s32_s30 = int_to_ptr.vmem [resolvable:$true] %s31_s30 }
  0x16   :  { %p1810_p9 = scmp.lt.u32.totalorder %s1806_s7, %s2168_s1 }
  0x18   :  { %p1812_p10 = pnand %p1810_p9, %p1807_p8 }
  0x1a   :  { %1815 = shalt.err (!%p1812_p10)
}
  0x1b   :  { %s1816_s12 = scalar_lea.vmem %s32_s30, 1024  ;;  %p1821_p12 = scmp.lt.s32.totalorder %s32_s30, %s32_s30 }
  0x1c   :  { %p1817_p11 = scmp.ne.s32.totalorder %s32_s30, %s1816_s12  ;;  %p1822_p13 = scmp.lt.s32.totalorder %s1816_s12, %s1816_s12 }
  0x1e   :  { %p1823_p0 = por %p1822_p13, %p1821_p12 }
  0x20   :  { %p1824_p1 = pnand %p1823_p0, %p1817_p11 }
  0x22   :  { %1827 = shalt.err (!%p1824_p1)
}
  0x23   :  { %37 = dma.hbm_to_vmem [thread:$0]  %s2168_s1, 1024, %s32_s30, [#allocation8], %s1881_s25, %s1881_s25, %s1882_s26  }
  0x24   :  { %1872 = dma.done.wait [#allocation5], 4096  }
  0x25   :  { %1873 = vsyncadd [#allocation5], 4294963200 }
  0x26   :  { %1874 = dma.done.wait [#allocation8], 1024  }
  0x27   :  { %1875 = vsyncadd [#allocation8], 4294966272  ;;  %v1742_v0 = vld [vmem:[#allocation7] sm:$0xff]   ;;  %v1743_v1 = vld [vmem:[#allocation7 + $0x8] sm:$0xff]   ;;  %v1884_v40 = vmov 0.0   ;;  %s1885_s1 = smov [#allocation9]  }
  0x28   :  { %1639 = vmatprep.subr.bf16.mxu0 %v1742_v0  ;;  %1719 = vmatprep.subr.bf16.mxu1 %v1742_v0  ;;  %v1744_v2 = vld [vmem:[#allocation7 + $0x10] sm:$0xff]   ;;  %v1745_v3 = vld [vmem:[#allocation7 + $0x18] sm:$0xff]   ;;  %v1750_v4 = vld [vmem:[#allocation4] sm:$0xff]   ;;  %51 = vst [vmem:[#allocation2] sm:$0x1] %v1884_v40  ;;  %s1213_s14 = sshll.u32 %s1885_s1, 4  ;;  %s1214_s14 = int_to_ptr.vmem [resolvable:$true] %s1213_s14 }
  0x29   :  { %1640 = vmatpush3.bf16.msra.mxu0 %v1742_v0  ;;  %1727 = vmatpush3.bf16.msra.mxu1 %v1742_v0  ;;  %v1746_v5 = vld [vmem:[#allocation7 + $0x20] sm:$0xff]   ;;  %v1747_v6 = vld [vmem:[#allocation7 + $0x28] sm:$0xff]   ;;  %v1748_v7 = vld [vmem:[#allocation7 + $0x30] sm:$0xff]   ;;  %52 = vst [vmem:[#allocation3] sm:$0x1] %v1884_v40  ;;  %s1828_s15 = scalar_lea.vmem %s1214_s14, 4096  ;;  %p1833_p3 = scmp.lt.s32.totalorder %s1214_s14, %s1214_s14 }
  0x2a   :  { %1641 = vmatprep.subr.bf16.mxu0 %v1743_v1  ;;  %1720 = vmatprep.subr.bf16.mxu1 %v1743_v1  ;;  %v1749_v8 = vld [vmem:[#allocation7 + $0x38] sm:$0xff]   ;;  %v1766_v9 = vld [vmem:[#allocation4 + $0x80] sm:$0xff]   ;;  %v1751_v10 = vld [vmem:[#allocation4 + $0x8] sm:$0xff]   ;;  %p1829_p2 = scmp.ne.s32.totalorder %s1214_s14, %s1828_s15  ;;  %p1834_p4 = scmp.lt.s32.totalorder %s1828_s15, %s1828_s15 }
  0x2b   :  { %1655 = vmatprep.mubr.bf16.mxu0 %v1750_v4  ;;  %1687 = vmatprep.mubr.bf16.mxu1 %v1766_v9  ;;  %v1752_v11 = vld [vmem:[#allocation4 + $0x10] sm:$0xff]   ;;  %v1767_v12 = vld [vmem:[#allocation4 + $0x88] sm:$0xff]   ;;  %v1753_v14 = vld [vmem:[#allocation4 + $0x18] sm:$0xff]  }
  0x2c   :  { %v1768_v13 = vld [vmem:[#allocation4 + $0x90] sm:$0xff]   ;;  %v1754_v15 = vld [vmem:[#allocation4 + $0x20] sm:$0xff]   ;;  %v1769_v16 = vld [vmem:[#allocation4 + $0x98] sm:$0xff]   ;;  %p1835_p5 = por %p1834_p4, %p1833_p3 }
  0x2d   :  { %1642 = vmatpush3.bf16.msra.mxu0 %v1743_v1  ;;  %1728 = vmatpush3.bf16.msra.mxu1 %v1743_v1  ;;  %v1770_v17 = vld [vmem:[#allocation4 + $0xa0] sm:$0xff]   ;;  %v1755_v18 = vld [vmem:[#allocation4 + $0x28] sm:$0xff]   ;;  %v1756_v20 = vld [vmem:[#allocation4 + $0x30] sm:$0xff]  }
  0x2e   :  { %1643 = vmatprep.subr.bf16.mxu0 %v1744_v2  ;;  %1721 = vmatprep.subr.bf16.mxu1 %v1744_v2  ;;  %v1771_v19 = vld [vmem:[#allocation4 + $0xa8] sm:$0xff]   ;;  %v1772_v21 = vld [vmem:[#allocation4 + $0xb0] sm:$0xff]   ;;  %v1757_v22 = vld [vmem:[#allocation4 + $0x38] sm:$0xff]   ;;  %p1836_p6 = pnand %p1835_p5, %p1829_p2 }
  0x2f   :  { %v1773_v23 = vld [vmem:[#allocation4 + $0xb8] sm:$0xff]   ;;  %v1758_v24 = vld [vmem:[#allocation4 + $0x40] sm:$0xff]   ;;  %v1759_v26 = vld [vmem:[#allocation4 + $0x48] sm:$0xff]  }
  0x30   :  { %v1774_v25 = vld [vmem:[#allocation4 + $0xc0] sm:$0xff]   ;;  %v1775_v27 = vld [vmem:[#allocation4 + $0xc8] sm:$0xff]   ;;  %v1760_v28 = vld [vmem:[#allocation4 + $0x50] sm:$0xff]  }
  0x31   :  { %1644 = vmatpush3.bf16.msra.mxu0 %v1744_v2  ;;  %1729 = vmatpush3.bf16.msra.mxu1 %v1744_v2  ;;  %v1776_v29 = vld [vmem:[#allocation4 + $0xd0] sm:$0xff]   ;;  %v1761_v30 = vld [vmem:[#allocation4 + $0x58] sm:$0xff]   ;;  %v1762_v32 = vld [vmem:[#allocation4 + $0x60] sm:$0xff]  }
  0x32   :  { %1645 = vmatprep.subr.bf16.mxu0 %v1745_v3  ;;  %1722 = vmatprep.subr.bf16.mxu1 %v1745_v3  ;;  %v1777_v31 = vld [vmem:[#allocation4 + $0xd8] sm:$0xff]   ;;  %v1778_v33 = vld [vmem:[#allocation4 + $0xe0] sm:$0xff]   ;;  %v1763_v34 = vld [vmem:[#allocation4 + $0x68] sm:$0xff]  }
  0x33   :  { %v1779_v35 = vld [vmem:[#allocation4 + $0xe8] sm:$0xff]   ;;  %v1764_v36 = vld [vmem:[#allocation4 + $0x70] sm:$0xff]   ;;  %v1765_v38 = vld [vmem:[#allocation4 + $0x78] sm:$0xff]  }
  0x34   :  { %v1780_v37 = vld [vmem:[#allocation4 + $0xf0] sm:$0xff]   ;;  %v1781_v39 = vld [vmem:[#allocation4 + $0xf8] sm:$0xff]  }
  0x35   :  { %1646 = vmatpush3.bf16.msra.mxu0 %v1745_v3  ;;  %1730 = vmatpush3.bf16.msra.mxu1 %v1745_v3 }
  0x36   :  { %1647 = vmatprep.subr.bf16.mxu0 %v1746_v5  ;;  %1723 = vmatprep.subr.bf16.mxu1 %v1746_v5 }
  0x39   :  { %1648 = vmatpush3.bf16.msra.mxu0 %v1746_v5  ;;  %1731 = vmatpush3.bf16.msra.mxu1 %v1746_v5 }
  0x3a   :  { %1649 = vmatprep.subr.bf16.mxu0 %v1747_v6  ;;  %1724 = vmatprep.subr.bf16.mxu1 %v1747_v6 }
  0x3d   :  { %1650 = vmatpush3.bf16.msra.mxu0 %v1747_v6  ;;  %1732 = vmatpush3.bf16.msra.mxu1 %v1747_v6 }
  0x3e   :  { %1651 = vmatprep.subr.bf16.mxu0 %v1748_v7  ;;  %1725 = vmatprep.subr.bf16.mxu1 %v1748_v7 }
  0x41   :  { %1652 = vmatpush3.bf16.msra.mxu0 %v1748_v7  ;;  %1733 = vmatpush3.bf16.msra.mxu1 %v1748_v7 }
  0x42   :  { %1653 = vmatprep.subr.bf16.mxu0 %v1749_v8  ;;  %1726 = vmatprep.subr.bf16.mxu1 %v1749_v8 }
  0x45   :  { %1654 = vmatpush3.bf16.msra.mxu0 %v1749_v8  ;;  %1734 = vmatpush3.bf16.msra.mxu1 %v1749_v8 }
  0x48   :  { %1656 = vmatmul.mubr.bf16.vlgmr.msra.gmra.mrb[0].mxu0 %v1751_v10  ;;  %1688 = vmatmul.mubr.bf16.vlgmr.msra.gmra.mrb[0].mxu1 %v1767_v12 }
  0x49   :  { %1659 = vmatprep.mubr.bf16.mxu0 %v1752_v11  ;;  %1691 = vmatprep.mubr.bf16.mxu1 %v1768_v13 }
  0x50   :  { %1660 = vmatmul.mubr.bf16.gmra.mrb[4].mxu0 %v1753_v14  ;;  %1692 = vmatmul.mubr.bf16.gmra.mrb[4].mxu1 %v1769_v16 }
  0x51   :  { %1663 = vmatprep.mubr.bf16.mxu0 %v1754_v15  ;;  %1695 = vmatprep.mubr.bf16.mxu1 %v1770_v17 }
  0x58   :  { %1664 = vmatmul.mubr.bf16.gmra.mrb[8].mxu0 %v1755_v18  ;;  %1696 = vmatmul.mubr.bf16.gmra.mrb[8].mxu1 %v1771_v19 }
  0x59   :  { %1667 = vmatprep.mubr.bf16.mxu0 %v1756_v20  ;;  %1699 = vmatprep.mubr.bf16.mxu1 %v1772_v21 }
  0x60   :  { %1668 = vmatmul.mubr.bf16.gmra.mrb[12].mxu0 %v1757_v22  ;;  %1700 = vmatmul.mubr.bf16.gmra.mrb[12].mxu1 %v1773_v23 }
  0x61   :  { %1671 = vmatprep.mubr.bf16.mxu0 %v1758_v24  ;;  %1703 = vmatprep.mubr.bf16.mxu1 %v1774_v25 }
  0x68   :  { %1672 = vmatmul.mubr.bf16.gmra.mrb[16].mxu0 %v1759_v26  ;;  %1704 = vmatmul.mubr.bf16.gmra.mrb[16].mxu1 %v1775_v27 }
  0x69   :  { %1675 = vmatprep.mubr.bf16.mxu0 %v1760_v28  ;;  %1707 = vmatprep.mubr.bf16.mxu1 %v1776_v29 }
  0x70   :  { %1676 = vmatmul.mubr.bf16.gmra.mrb[20].mxu0 %v1761_v30  ;;  %1708 = vmatmul.mubr.bf16.gmra.mrb[20].mxu1 %v1777_v31 }
  0x71   :  { %1679 = vmatprep.mubr.bf16.mxu0 %v1762_v32  ;;  %1711 = vmatprep.mubr.bf16.mxu1 %v1778_v33 }
  0x78   :  { %1680 = vmatmul.mubr.bf16.gmra.mrb[24].mxu0 %v1763_v34  ;;  %1712 = vmatmul.mubr.bf16.gmra.mrb[24].mxu1 %v1779_v35 }
  0x79   :  { %1683 = vmatprep.mubr.bf16.mxu0 %v1764_v36  ;;  %1715 = vmatprep.mubr.bf16.mxu1 %v1780_v37 }
  0x80   :  { %1684 = vmatmul.mubr.bf16.gmra.mrb[28].mxu0 %v1765_v38  ;;  %1716 = vmatmul.mubr.bf16.gmra.mrb[28].mxu1 %v1781_v39 }
 0x11b   :  { %v1657_v41 = vpop.f32.mrb[0].mxu0  ;;  %v1942_v42 = vpop.f32.mrb[0].mxu1 }
 0x11c   :  { %v407_v43 = vpop.f32.mrb[1].mxu0  ;;  %v1944_v44 = vpop.f32.mrb[1].mxu1  ;;  %v1057_v56 = vmul.f32 %v1657_v41, %v1657_v41 }
 0x11d   :  { %v1658_v45 = vpop.f32.mrb[2].mxu0  ;;  %v1946_v46 = vpop.f32.mrb[2].mxu1  ;;  %v1055_v47 = vmul.f32 %v407_v43, %v407_v43 }
 0x11e   :  { %v1416_v48 = vpack.c.bf16 %v1658_v45, %v1657_v41  ;;  %v410_v49 = vpop.f32.mrb[3].mxu0  ;;  %v1496_v50 = vpack.c.bf16 %v1946_v46, %v1942_v42  ;;  %v1950_v51 = vpop.f32.mrb[3].mxu1  ;;  %v1058_v59 = vmul.f32 %v1658_v45, %v1658_v45 }
 0x11f   :  { %v1411_v52 = vpack.c.bf16 %v410_v49, %v407_v43  ;;  %v983_v53 = vadd.f32 %v410_v49, %v407_v43  ;;  %v1056_v54 = vmul.f32 %v410_v49, %v410_v49  ;;  %v1491_v55 = vpack.c.bf16 %v1950_v51, %v1944_v44 }
 0x120   :  { %1568 = vst [vmem:[#allocation9 + $0x8] sm:$0xff] %v1416_v48   ;;  %1584 = vst [vmem:[#allocation9 + $0x88] sm:$0xff] %v1496_v50  }
 0x121   :  { %1412 = vst [vmem:[#allocation9] sm:$0xff] %v1411_v52   ;;  %v984_v57 = vadd.f32 %v1657_v41, %v983_v53  ;;  %v1119_v58 = vadd.f32 %v1056_v54, %v1055_v47  ;;  %1583 = vst [vmem:[#allocation9 + $0x80] sm:$0xff] %v1491_v55  }
 0x123   :  { %v1120_v60 = vadd.f32 %v1119_v58, %v1057_v56  ;;  %v1661_v61 = vpop.f32.mrb[4].mxu0  ;;  %v985_v62 = vadd.f32 %v1658_v45, %v984_v57  ;;  %v1954_v63 = vpop.f32.mrb[4].mxu1 }
 0x124   :  { %v423_v0 = vpop.f32.mrb[5].mxu0  ;;  %v1956_v1 = vpop.f32.mrb[5].mxu1  ;;  %v1061_v16 = vmul.f32 %v1661_v61, %v1661_v61 }
 0x125   :  { %v986_v2 = vadd.f32 %v985_v62, %v423_v0  ;;  %v1059_v3 = vmul.f32 %v423_v0, %v423_v0  ;;  %v1121_v4 = vadd.f32 %v1120_v60, %v1058_v59  ;;  %v1662_v5 = vpop.f32.mrb[6].mxu0  ;;  %v1958_v6 = vpop.f32.mrb[6].mxu1 }
 0x126   :  { %v1426_v7 = vpack.c.bf16 %v1662_v5, %v1661_v61  ;;  %v426_v8 = vpop.f32.mrb[7].mxu0  ;;  %v1506_v9 = vpack.c.bf16 %v1958_v6, %v1954_v63  ;;  %v1962_v10 = vpop.f32.mrb[7].mxu1  ;;  %v1062_v19 = vmul.f32 %v1662_v5, %v1662_v5 }
 0x127   :  { %v1122_v11 = vadd.f32 %v1121_v4, %v1059_v3  ;;  %v1421_v12 = vpack.c.bf16 %v426_v8, %v423_v0  ;;  %v987_v13 = vadd.f32 %v986_v2, %v426_v8  ;;  %v1060_v14 = vmul.f32 %v426_v8, %v426_v8 }
 0x128   :  { %1570 = vst [vmem:[#allocation9 + $0x18] sm:$0xff] %v1426_v7   ;;  %1586 = vst [vmem:[#allocation9 + $0x98] sm:$0xff] %v1506_v9   ;;  %v1501_v15 = vpack.c.bf16 %v1962_v10, %v1956_v1 }
 0x129   :  { %1569 = vst [vmem:[#allocation9 + $0x10] sm:$0xff] %v1421_v12   ;;  %v988_v17 = vadd.f32 %v1661_v61, %v987_v13  ;;  %v1123_v18 = vadd.f32 %v1122_v11, %v1060_v14 }
 0x12a   :  { %1585 = vst [vmem:[#allocation9 + $0x90] sm:$0xff] %v1501_v15  }
 0x12b   :  { %v1124_v20 = vadd.f32 %v1123_v18, %v1061_v16  ;;  %v1665_v21 = vpop.f32.mrb[8].mxu0  ;;  %v989_v22 = vadd.f32 %v1662_v5, %v988_v17  ;;  %v1966_v23 = vpop.f32.mrb[8].mxu1 }
 0x12c   :  { %v439_v24 = vpop.f32.mrb[9].mxu0  ;;  %v1968_v25 = vpop.f32.mrb[9].mxu1  ;;  %v1065_v40 = vmul.f32 %v1665_v21, %v1665_v21 }
 0x12d   :  { %v990_v26 = vadd.f32 %v989_v22, %v439_v24  ;;  %v1063_v27 = vmul.f32 %v439_v24, %v439_v24  ;;  %v1125_v28 = vadd.f32 %v1124_v20, %v1062_v19  ;;  %v1666_v29 = vpop.f32.mrb[10].mxu0  ;;  %v1970_v30 = vpop.f32.mrb[10].mxu1 }
 0x12e   :  { %v1436_v31 = vpack.c.bf16 %v1666_v29, %v1665_v21  ;;  %v442_v32 = vpop.f32.mrb[11].mxu0  ;;  %v1516_v33 = vpack.c.bf16 %v1970_v30, %v1966_v23  ;;  %v1974_v34 = vpop.f32.mrb[11].mxu1  ;;  %v1066_v45 = vmul.f32 %v1666_v29, %v1666_v29 }
 0x12f   :  { %v1126_v35 = vadd.f32 %v1125_v28, %v1063_v27  ;;  %v1431_v36 = vpack.c.bf16 %v442_v32, %v439_v24  ;;  %v991_v37 = vadd.f32 %v990_v26, %v442_v32  ;;  %v1064_v38 = vmul.f32 %v442_v32, %v442_v32 }
 0x130   :  { %1572 = vst [vmem:[#allocation9 + $0x28] sm:$0xff] %v1436_v31   ;;  %1588 = vst [vmem:[#allocation9 + $0xa8] sm:$0xff] %v1516_v33   ;;  %v1511_v39 = vpack.c.bf16 %v1974_v34, %v1968_v25 }
 0x131   :  { %1571 = vst [vmem:[#allocation9 + $0x20] sm:$0xff] %v1431_v36   ;;  %v992_v41 = vadd.f32 %v1665_v21, %v991_v37  ;;  %v1127_v43 = vadd.f32 %v1126_v35, %v1064_v38 }
 0x132   :  { %1587 = vst [vmem:[#allocation9 + $0xa0] sm:$0xff] %v1511_v39  }
 0x133   :  { %v1128_v47 = vadd.f32 %v1127_v43, %v1065_v40  ;;  %v1669_v48 = vpop.f32.mrb[12].mxu0  ;;  %v993_v49 = vadd.f32 %v1666_v29, %v992_v41  ;;  %v1978_v50 = vpop.f32.mrb[12].mxu1 }
 0x134   :  { %v455_v52 = vpop.f32.mrb[13].mxu0  ;;  %v1980_v53 = vpop.f32.mrb[13].mxu1  ;;  %v1069_v7 = vmul.f32 %v1669_v48, %v1669_v48 }
 0x135   :  { %v994_v54 = vadd.f32 %v993_v49, %v455_v52  ;;  %v1067_v55 = vmul.f32 %v455_v52, %v455_v52  ;;  %v1129_v56 = vadd.f32 %v1128_v47, %v1066_v45  ;;  %v1670_v57 = vpop.f32.mrb[14].mxu0  ;;  %v1982_v58 = vpop.f32.mrb[14].mxu1 }
 0x136   :  { %v1446_v59 = vpack.c.bf16 %v1670_v57, %v1669_v48  ;;  %v458_v60 = vpop.f32.mrb[15].mxu0  ;;  %v1526_v61 = vpack.c.bf16 %v1982_v58, %v1978_v50  ;;  %v1986_v62 = vpop.f32.mrb[15].mxu1  ;;  %v1070_v11 = vmul.f32 %v1670_v57, %v1670_v57 }
 0x137   :  { %v1130_v0 = vadd.f32 %v1129_v56, %v1067_v55  ;;  %v1441_v2 = vpack.c.bf16 %v458_v60, %v455_v52  ;;  %v995_v3 = vadd.f32 %v994_v54, %v458_v60  ;;  %v1068_v4 = vmul.f32 %v458_v60, %v458_v60 }
 0x138   :  { %1574 = vst [vmem:[#allocation9 + $0x38] sm:$0xff] %v1446_v59   ;;  %1590 = vst [vmem:[#allocation9 + $0xb8] sm:$0xff] %v1526_v61   ;;  %v1521_v5 = vpack.c.bf16 %v1986_v62, %v1980_v53 }
 0x139   :  { %1573 = vst [vmem:[#allocation9 + $0x30] sm:$0xff] %v1441_v2   ;;  %v996_v8 = vadd.f32 %v1669_v48, %v995_v3  ;;  %v1131_v9 = vadd.f32 %v1130_v0, %v1068_v4 }
 0x13a   :  { %1589 = vst [vmem:[#allocation9 + $0xb0] sm:$0xff] %v1521_v5  }
 0x13b   :  { %v1132_v12 = vadd.f32 %v1131_v9, %v1069_v7  ;;  %v1673_v13 = vpop.f32.mrb[16].mxu0  ;;  %v997_v14 = vadd.f32 %v1670_v57, %v996_v8  ;;  %v1990_v15 = vpop.f32.mrb[16].mxu1 }
 0x13c   :  { %v471_v16 = vpop.f32.mrb[17].mxu0  ;;  %v1992_v17 = vpop.f32.mrb[17].mxu1  ;;  %v1073_v36 = vmul.f32 %v1673_v13, %v1673_v13 }
 0x13d   :  { %v998_v18 = vadd.f32 %v997_v14, %v471_v16  ;;  %v1071_v19 = vmul.f32 %v471_v16, %v471_v16  ;;  %v1133_v20 = vadd.f32 %v1132_v12, %v1070_v11  ;;  %v1674_v21 = vpop.f32.mrb[18].mxu0  ;;  %v1994_v22 = vpop.f32.mrb[18].mxu1 }
 0x13e   :  { %v1456_v24 = vpack.c.bf16 %v1674_v21, %v1673_v13  ;;  %v474_v26 = vpop.f32.mrb[19].mxu0  ;;  %v1536_v27 = vpack.c.bf16 %v1994_v22, %v1990_v15  ;;  %v1998_v28 = vpop.f32.mrb[19].mxu1  ;;  %v1074_v39 = vmul.f32 %v1674_v21, %v1674_v21 }
 0x13f   :  { %v1134_v29 = vadd.f32 %v1133_v20, %v1071_v19  ;;  %v1451_v31 = vpack.c.bf16 %v474_v26, %v471_v16  ;;  %v999_v32 = vadd.f32 %v998_v18, %v474_v26  ;;  %v1072_v33 = vmul.f32 %v474_v26, %v474_v26 }
 0x140   :  { %1576 = vst [vmem:[#allocation9 + $0x48] sm:$0xff] %v1456_v24   ;;  %1592 = vst [vmem:[#allocation9 + $0xc8] sm:$0xff] %v1536_v27   ;;  %v1531_v35 = vpack.c.bf16 %v1998_v28, %v1992_v17 }
 0x141   :  { %1575 = vst [vmem:[#allocation9 + $0x40] sm:$0xff] %v1451_v31   ;;  %v1000_v37 = vadd.f32 %v1673_v13, %v999_v32  ;;  %v1135_v38 = vadd.f32 %v1134_v29, %v1072_v33 }
 0x142   :  { %1591 = vst [vmem:[#allocation9 + $0xc0] sm:$0xff] %v1531_v35  }
 0x143   :  { %v1136_v40 = vadd.f32 %v1135_v38, %v1073_v36  ;;  %v1677_v41 = vpop.f32.mrb[20].mxu0  ;;  %v1001_v43 = vadd.f32 %v1674_v21, %v1000_v37  ;;  %v2002_v45 = vpop.f32.mrb[20].mxu1 }
 0x144   :  { %v487_v47 = vpop.f32.mrb[21].mxu0  ;;  %v2004_v48 = vpop.f32.mrb[21].mxu1  ;;  %v1077_v7 = vmul.f32 %v1677_v41, %v1677_v41 }
 0x145   :  { %v1002_v49 = vadd.f32 %v1001_v43, %v487_v47  ;;  %v1075_v52 = vmul.f32 %v487_v47, %v487_v47  ;;  %v1137_v54 = vadd.f32 %v1136_v40, %v1074_v39  ;;  %v1678_v55 = vpop.f32.mrb[22].mxu0  ;;  %v2006_v56 = vpop.f32.mrb[22].mxu1 }
 0x146   :  { %v1466_v57 = vpack.c.bf16 %v1678_v55, %v1677_v41  ;;  %v490_v59 = vpop.f32.mrb[23].mxu0  ;;  %v1546_v60 = vpack.c.bf16 %v2006_v56, %v2002_v45  ;;  %v2010_v61 = vpop.f32.mrb[23].mxu1  ;;  %v1078_v11 = vmul.f32 %v1678_v55, %v1678_v55 }
 0x147   :  { %v1138_v0 = vadd.f32 %v1137_v54, %v1075_v52  ;;  %v1461_v2 = vpack.c.bf16 %v490_v59, %v487_v47  ;;  %v1003_v3 = vadd.f32 %v1002_v49, %v490_v59  ;;  %v1076_v4 = vmul.f32 %v490_v59, %v490_v59 }
 0x148   :  { %1578 = vst [vmem:[#allocation9 + $0x58] sm:$0xff] %v1466_v57   ;;  %1594 = vst [vmem:[#allocation9 + $0xd8] sm:$0xff] %v1546_v60   ;;  %v1541_v5 = vpack.c.bf16 %v2010_v61, %v2004_v48 }
 0x149   :  { %1577 = vst [vmem:[#allocation9 + $0x50] sm:$0xff] %v1461_v2   ;;  %v1004_v8 = vadd.f32 %v1677_v41, %v1003_v3  ;;  %v1139_v9 = vadd.f32 %v1138_v0, %v1076_v4 }
 0x14a   :  { %1593 = vst [vmem:[#allocation9 + $0xd0] sm:$0xff] %v1541_v5  }
 0x14b   :  { %v1140_v12 = vadd.f32 %v1139_v9, %v1077_v7  ;;  %v1681_v13 = vpop.f32.mrb[24].mxu0  ;;  %v1005_v14 = vadd.f32 %v1678_v55, %v1004_v8  ;;  %v2014_v16 = vpop.f32.mrb[24].mxu1 }
 0x14c   :  { %v503_v18 = vpop.f32.mrb[25].mxu0  ;;  %v2016_v19 = vpop.f32.mrb[25].mxu1  ;;  %v1081_v40 = vmul.f32 %v1681_v13, %v1681_v13 }
 0x14d   :  { %v1006_v20 = vadd.f32 %v1005_v14, %v503_v18  ;;  %v1079_v21 = vmul.f32 %v503_v18, %v503_v18  ;;  %v1141_v24 = vadd.f32 %v1140_v12, %v1078_v11  ;;  %v1682_v26 = vpop.f32.mrb[26].mxu0  ;;  %v2018_v27 = vpop.f32.mrb[26].mxu1 }
 0x14e   :  { %v1476_v29 = vpack.c.bf16 %v1682_v26, %v1681_v13  ;;  %v506_v31 = vpop.f32.mrb[27].mxu0  ;;  %v1556_v32 = vpack.c.bf16 %v2018_v27, %v2014_v16  ;;  %v2022_v33 = vpop.f32.mrb[27].mxu1  ;;  %v1082_v47 = vmul.f32 %v1682_v26, %v1682_v26 }
 0x14f   :  { %v1142_v35 = vadd.f32 %v1141_v24, %v1079_v21  ;;  %v1471_v36 = vpack.c.bf16 %v506_v31, %v503_v18  ;;  %v1007_v37 = vadd.f32 %v1006_v20, %v506_v31  ;;  %v1080_v38 = vmul.f32 %v506_v31, %v506_v31 }
 0x150   :  { %1580 = vst [vmem:[#allocation9 + $0x68] sm:$0xff] %v1476_v29   ;;  %1596 = vst [vmem:[#allocation9 + $0xe8] sm:$0xff] %v1556_v32   ;;  %v1551_v39 = vpack.c.bf16 %v2022_v33, %v2016_v19  ;;  %v1087_v32 = vmul.f32 %v1944_v44, %v1944_v44 }
 0x151   :  { %1579 = vst [vmem:[#allocation9 + $0x60] sm:$0xff] %v1471_v36   ;;  %v1008_v41 = vadd.f32 %v1681_v13, %v1007_v37  ;;  %v1143_v43 = vadd.f32 %v1142_v35, %v1080_v38 }
 0x152   :  { %1595 = vst [vmem:[#allocation9 + $0xe0] sm:$0xff] %v1551_v39  }
 0x153   :  { %v1144_v49 = vadd.f32 %v1143_v43, %v1081_v40  ;;  %v1685_v52 = vpop.f32.mrb[28].mxu0  ;;  %v1009_v54 = vadd.f32 %v1682_v26, %v1008_v41  ;;  %v2026_v55 = vpop.f32.mrb[28].mxu1 }
 0x154   :  { %v519_v57 = vpop.f32.mrb[29].mxu0  ;;  %v2028_v59 = vpop.f32.mrb[29].mxu1  ;;  %v1085_v20 = vmul.f32 %v1685_v52, %v1685_v52 }
 0x155   :  { %v1010_v60 = vadd.f32 %v1009_v54, %v519_v57  ;;  %v1083_v0 = vmul.f32 %v519_v57, %v519_v57  ;;  %v1145_v2 = vadd.f32 %v1144_v49, %v1082_v47  ;;  %v1686_v3 = vpop.f32.mrb[30].mxu0  ;;  %v2030_v4 = vpop.f32.mrb[30].mxu1 }
 0x156   :  { %v1486_v5 = vpack.c.bf16 %v1686_v3, %v1685_v52  ;;  %v522_v7 = vpop.f32.mrb[31].mxu0  ;;  %v1566_v8 = vpack.c.bf16 %v2030_v4, %v2026_v55  ;;  %v2034_v9 = vpop.f32.mrb[31].mxu1  ;;  %v1086_v26 = vmul.f32 %v1686_v3, %v1686_v3 }
 0x157   :  { %v1146_v11 = vadd.f32 %v1145_v2, %v1083_v0  ;;  %v1481_v12 = vpack.c.bf16 %v522_v7, %v519_v57  ;;  %v1011_v13 = vadd.f32 %v1010_v60, %v522_v7  ;;  %v1084_v14 = vmul.f32 %v522_v7, %v522_v7 }
 0x158   :  { %1582 = vst [vmem:[#allocation9 + $0x78] sm:$0xff] %v1486_v5   ;;  %1598 = vst [vmem:[#allocation9 + $0xf8] sm:$0xff] %v1566_v8   ;;  %v1561_v18 = vpack.c.bf16 %v2034_v9, %v2028_v59 }
 0x159   :  { %1581 = vst [vmem:[#allocation9 + $0x70] sm:$0xff] %v1481_v12   ;;  %v1012_v21 = vadd.f32 %v1685_v52, %v1011_v13  ;;  %v1147_v24 = vadd.f32 %v1146_v11, %v1084_v14 }
 0x15a   :  { %1597 = vst [vmem:[#allocation9 + $0xf0] sm:$0xff] %v1561_v18  }
 0x15b   :  { %v1148_v29 = vadd.f32 %v1147_v24, %v1085_v20  ;;  %v1013_v31 = vadd.f32 %v1686_v3, %v1012_v21 }
 0x15c   :  { %1839 = shalt.err (!%p1836_p6)
}
 0x15d   :  { %s1840_s18 = scalar_lea.hbm %s2170_s3, 4096 }
 0x15e   :  { %p1841_p7 = scmp.ne.s32.totalorder %s2170_s3, %s1840_s18  ;;  %p1844_p8 = scmp.lt.u32.totalorder %s1840_s18, %s2170_s3 }
 0x160   :  { %p1846_p9 = pnand %p1844_p8, %p1841_p7 }
 0x162   :  { %1849 = shalt.err (!%p1846_p9)
}
 0x163   :  { %1219 = dma.vmem_to_hbm [thread:$0]  %s1214_s14, 4096, %s2170_s3, [#allocation6], %s1881_s25, %s1881_s25, %s1882_s26   ;;  %v1014_v35 = vadd.f32 %v1013_v31, %v1944_v44  ;;  %v1149_v36 = vadd.f32 %v1148_v29, %v1086_v26  ;;  %v1088_v39 = vmul.f32 %v1950_v51, %v1950_v51  ;;  %v1089_v40 = vmul.f32 %v1942_v42, %v1942_v42 }
 0x164   :  { %v1090_v47 = vmul.f32 %v1946_v46, %v1946_v46  ;;  %v1091_v44 = vmul.f32 %v1956_v1, %v1956_v1  ;;  %v1092_v0 = vmul.f32 %v1962_v10, %v1962_v10  ;;  %v1096_v13 = vmul.f32 %v1974_v34, %v1974_v34  ;;  %s1886_s28 = smov [#allocation10]  }
 0x165   :  { %v1150_v37 = vadd.f32 %v1149_v36, %v1087_v32  ;;  %v1015_v38 = vadd.f32 %v1014_v35, %v1950_v51  ;;  %v1100_v31 = vmul.f32 %v1986_v62, %v1986_v62  ;;  %s1226_s29 = sshll.u32 %s1886_s28, 4  ;;  %s1227_s29 = int_to_ptr.vmem [resolvable:$true] %s1226_s29 }
 0x166   :  { %s1850_s30 = scalar_lea.vmem %s1227_s29, 32  ;;  %p1855_p11 = scmp.lt.s32.totalorder %s1227_s29, %s1227_s29 }
 0x167   :  { %v1016_v41 = vadd.f32 %v1942_v42, %v1015_v38  ;;  %v1151_v43 = vadd.f32 %v1150_v37, %v1088_v39  ;;  %v1093_v42 = vmul.f32 %v1954_v63, %v1954_v63  ;;  %p1851_p10 = scmp.ne.s32.totalorder %s1227_s29, %s1850_s30  ;;  %p1856_p12 = scmp.lt.s32.totalorder %s1850_s30, %s1850_s30 }
 0x169   :  { %v1152_v49 = vadd.f32 %v1151_v43, %v1089_v40  ;;  %v1017_v52 = vadd.f32 %v1946_v46, %v1016_v41  ;;  %v1094_v46 = vmul.f32 %v1958_v6, %v1958_v6  ;;  %v1104_v41 = vmul.f32 %v1998_v28, %v1998_v28  ;;  %p1857_p13 = por %p1856_p12, %p1855_p11 }
 0x16b   :  { %v1018_v54 = vadd.f32 %v1017_v52, %v1956_v1  ;;  %v1153_v57 = vadd.f32 %v1152_v49, %v1090_v47  ;;  %v1095_v1 = vmul.f32 %v1968_v25, %v1968_v25  ;;  %p1858_p0 = pnand %p1857_p13, %p1851_p10 }
 0x16d   :  { %v1154_v60 = vadd.f32 %v1153_v57, %v1091_v44  ;;  %v1019_v51 = vadd.f32 %v1018_v54, %v1962_v10 }
 0x16f   :  { %v1020_v2 = vadd.f32 %v1954_v63, %v1019_v51  ;;  %v1155_v3 = vadd.f32 %v1154_v60, %v1092_v0  ;;  %v1097_v63 = vmul.f32 %v1966_v23, %v1966_v23  ;;  %v1108_v60 = vmul.f32 %v2010_v61, %v2010_v61 }
 0x171   :  { %v1156_v5 = vadd.f32 %v1155_v3, %v1093_v42  ;;  %v1021_v7 = vadd.f32 %v1958_v6, %v1020_v2  ;;  %v1098_v6 = vmul.f32 %v1970_v30, %v1970_v30 }
 0x173   :  { %v1022_v8 = vadd.f32 %v1021_v7, %v1968_v25  ;;  %v1157_v11 = vadd.f32 %v1156_v5, %v1094_v46  ;;  %v1099_v25 = vmul.f32 %v1980_v53, %v1980_v53  ;;  %v1112_v7 = vmul.f32 %v2022_v33, %v2022_v33 }
 0x175   :  { %v1158_v12 = vadd.f32 %v1157_v11, %v1095_v1  ;;  %v1023_v10 = vadd.f32 %v1022_v8, %v1974_v34 }
 0x177   :  { %v1024_v14 = vadd.f32 %v1966_v23, %v1023_v10  ;;  %v1159_v18 = vadd.f32 %v1158_v12, %v1096_v13  ;;  %v1101_v23 = vmul.f32 %v1978_v50, %v1978_v50 }
 0x179   :  { %v1160_v20 = vadd.f32 %v1159_v18, %v1097_v63  ;;  %v1025_v21 = vadd.f32 %v1970_v30, %v1024_v14  ;;  %v1102_v30 = vmul.f32 %v1982_v58, %v1982_v58  ;;  %v1116_v14 = vmul.f32 %v2034_v9, %v2034_v9 }
 0x17b   :  { %v1026_v24 = vadd.f32 %v1025_v21, %v1980_v53  ;;  %v1161_v26 = vadd.f32 %v1160_v20, %v1098_v6  ;;  %v1103_v53 = vmul.f32 %v1992_v17, %v1992_v17 }
 0x17d   :  { %v1162_v29 = vadd.f32 %v1161_v26, %v1099_v25  ;;  %v1027_v34 = vadd.f32 %v1026_v24, %v1986_v62 }
 0x17f   :  { %v1028_v32 = vadd.f32 %v1978_v50, %v1027_v34  ;;  %v1163_v35 = vadd.f32 %v1162_v29, %v1100_v31  ;;  %v1105_v50 = vmul.f32 %v1990_v15, %v1990_v15 }
 0x181   :  { %v1164_v36 = vadd.f32 %v1163_v35, %v1101_v23  ;;  %v1029_v37 = vadd.f32 %v1982_v58, %v1028_v32  ;;  %v1106_v58 = vmul.f32 %v1994_v22, %v1994_v22  ;;  %v982_v35 = vld [vmem:[#allocation2] sm:$0x1] }
 0x183   :  { %v1030_v38 = vadd.f32 %v1029_v37, %v1992_v17  ;;  %v1165_v39 = vadd.f32 %v1164_v36, %v1102_v30  ;;  %v1107_v17 = vmul.f32 %v2004_v48, %v2004_v48  ;;  %v1054_v36 = vld [vmem:[#allocation3] sm:$0x1] }
 0x185   :  { %v1166_v40 = vadd.f32 %v1165_v39, %v1103_v53  ;;  %v1031_v62 = vadd.f32 %v1030_v38, %v1998_v28 }
 0x187   :  { %v1032_v43 = vadd.f32 %v1990_v15, %v1031_v62  ;;  %v1167_v47 = vadd.f32 %v1166_v40, %v1104_v41  ;;  %v1109_v15 = vmul.f32 %v2002_v45, %v2002_v45 }
 0x189   :  { %v1168_v49 = vadd.f32 %v1167_v47, %v1105_v50  ;;  %v1033_v52 = vadd.f32 %v1994_v22, %v1032_v43  ;;  %v1110_v22 = vmul.f32 %v2006_v56, %v2006_v56  ;;  %v1199_v47 = vld [vmem:[%s2169_s2] sm:$0x1] }
 0x18b   :  { %v1034_v44 = vadd.f32 %v1033_v52, %v2004_v48  ;;  %v1169_v54 = vadd.f32 %v1168_v49, %v1106_v58  ;;  %v1111_v48 = vmul.f32 %v2016_v19, %v2016_v19  ;;  %v1203_v52 = vld [vmem:[%s2169_s2 + $0x1] sm:$0x1] }
 0x18d   :  { %v1170_v57 = vadd.f32 %v1169_v54, %v1107_v17  ;;  %v1035_v28 = vadd.f32 %v1034_v44, %v2010_v61 }
 0x18f   :  { %v1036_v51 = vadd.f32 %v2002_v45, %v1035_v28  ;;  %v1171_v0 = vadd.f32 %v1170_v57, %v1108_v60  ;;  %v1113_v45 = vmul.f32 %v2014_v16, %v2014_v16 }
 0x191   :  { %v1172_v42 = vadd.f32 %v1171_v0, %v1109_v15  ;;  %v1037_v2 = vadd.f32 %v2006_v56, %v1036_v51  ;;  %v1114_v56 = vmul.f32 %v2018_v27, %v2018_v27 }
 0x193   :  { %v1038_v3 = vadd.f32 %v1037_v2, %v2016_v19  ;;  %v1173_v46 = vadd.f32 %v1172_v42, %v1110_v22  ;;  %v1115_v19 = vmul.f32 %v2028_v59, %v2028_v59 }
 0x195   :  { %v1174_v5 = vadd.f32 %v1173_v46, %v1111_v48  ;;  %v1039_v61 = vadd.f32 %v1038_v3, %v2022_v33 }
 0x197   :  { %v1040_v1 = vadd.f32 %v2014_v16, %v1039_v61  ;;  %v1175_v8 = vadd.f32 %v1174_v5, %v1112_v7  ;;  %v1117_v16 = vmul.f32 %v2026_v55, %v2026_v55 }
 0x199   :  { %v1176_v11 = vadd.f32 %v1175_v8, %v1113_v45  ;;  %v1041_v12 = vadd.f32 %v2018_v27, %v1040_v1  ;;  %v1118_v27 = vmul.f32 %v2030_v4, %v2030_v4 }
 0x19b   :  { %v1042_v10 = vadd.f32 %v1041_v12, %v2028_v59  ;;  %v1177_v13 = vadd.f32 %v1176_v11, %v1114_v56 }
 0x19d   :  { %v1178_v63 = vadd.f32 %v1177_v13, %v1115_v19  ;;  %v1043_v33 = vadd.f32 %v1042_v10, %v2034_v9 }
 0x19f   :  { %v1044_v18 = vadd.f32 %v2026_v55, %v1043_v33  ;;  %v1179_v6 = vadd.f32 %v1178_v63, %v1116_v14 }
 0x1a1   :  { %v1045_v20 = vadd.f32 %v2030_v4, %v1044_v18  ;;  %v1180_v21 = vadd.f32 %v1179_v6, %v1117_v16 }
 0x1a3   :  { %v1046_v59 = vrot.slane %v1045_v20, 4  ;;  %v1181_v25 = vadd.f32 %v1180_v21, %v1118_v27 }
 0x1a5   :  { %v1047_v24 = vadd.f32 %v1046_v59, %v1045_v20  ;;  %v1182_v26 = vrot.slane %v1181_v25, 4 }
 0x1a7   :  { %v1048_v29 = vrot.slane %v1047_v24, 2  ;;  %v1183_v34 = vadd.f32 %v1182_v26, %v1181_v25 }
 0x1a9   :  { %v1049_v31 = vadd.f32 %v1048_v29, %v1047_v24  ;;  %v1184_v9 = vrot.slane %v1183_v34, 2 }
 0x1ab   :  { %v1050_v23 = vrot.slane %v1049_v31, 1  ;;  %v1185_v32 = vadd.f32 %v1184_v9, %v1183_v34 }
 0x1ad   :  { %v1051_v30 = vadd.f32 %v1050_v23, %v1049_v31  ;;  %v1186_v55 = vrot.slane %v1185_v32, 1 }
 0x1af   :  { %v1052_v37 = vadd.f32 %v1051_v30, %v982_v35  ;;  %v1187_v53 = vadd.f32 %v1186_v55, %v1185_v32 }
 0x1b1   :  { %1053 = vst [vmem:[#allocation2] sm:$0x1] %v1052_v37  ;;  %v1188_v38 = vadd.f32 %v1187_v53, %v1054_v36 }
 0x1b3   :  { %1189 = vst [vmem:[#allocation3] sm:$0x1] %v1188_v38 }
 0x1b8   :  { %v1193_v4 = vld [vmem:[#allocation2] sm:$0x1] }
 0x1b9   :  { %v1194_v39 = vmul.f32 0.001953125, %v1193_v4 }
 0x1ba   :  { %v1195_v40 = vld [vmem:[#allocation3] sm:$0x1] }
 0x1bb   :  { %v1196_v62 = vmul.f32 0.001953125, %v1195_v40  ;;  %v1197_v41 = vmul.f32 %v1194_v39, %v1194_v39 }
 0x1bd   :  { %v1198_v50 = vsub.f32 %v1196_v62, %v1197_v41 }
 0x1bf   :  { %v1200_v43 = vadd.f32 1e-05, %v1198_v50 }
 0x1c1   :  { %1782 = vrsqrt.f32 %v1200_v43 }
 0x1cb   :  { %v1783_v58 = vpop.eup %1782 }
 0x1cc   :  { %v1202_v49 = vmul.f32 %v1783_v58, %v1199_v47 }
 0x1ce   :  { %v1204_v17 = vmul.f32 %v1202_v49, %v1194_v39  ;;  %1206 = vst [vmem:[#allocation10] sm:$0x1] %v1202_v49 }
 0x1d0   :  { %v1205_v44 = vsub.f32 %v1203_v52, %v1204_v17 }
 0x1d2   :  { %1207 = vst [vmem:[#allocation10 + $0x1] sm:$0x1] %v1205_v44 }
 0x1d3   :  { %1861 = shalt.err (!%p1858_p0)
}
 0x1d4   :  { %s1862_s7 = scalar_lea.hbm %s2171_s4, 32 }
 0x1d5   :  { %p1863_p1 = scmp.ne.s32.totalorder %s2171_s4, %s1862_s7  ;;  %p1866_p2 = scmp.lt.u32.totalorder %s1862_s7, %s2171_s4 }
 0x1d7   :  { %p1868_p3 = pnand %p1866_p2, %p1863_p1 }
 0x1d9   :  { %1871 = shalt.err (!%p1868_p3)
}
 0x1da   :  { %1229 = dma.vmem_to_hbm [thread:$0]  %s1227_s29, 32, %s2171_s4, [#allocation11]  }
 0x1db   :  { %1876 = dma.done.wait [#allocation6], 4096  }
 0x1dc   :  { %1877 = vsyncadd [#allocation6], 4294963200 }
 0x1dd   :  { %1878 = dma.done.wait [#allocation11], 32  }
 0x1de   :  { %1879 = vsyncadd [#allocation11], 4294967264 }
 0x1df   :  { %1236 = vsyncpa [#allocation5], 1 }
 0x1e0   :  { %1237 = vsyncpa [#allocation8], 1 }
 0x1e1   :  { %1238 = vsyncpa [#allocation6], 1 }
 0x1e2   :  { %1239 = vsyncpa [#allocation11], 1 }

</bundles_post_ra>
